<compile_context>
chip_gen: v7x
topology: tpu7x:2x2x1
jax: 0.10.0
libtpu: 0.0.40
codegen_flags: <defaults>
</compile_context>

<pallas_src>
import functools

import jax
import jax.numpy as jnp
from jax.experimental import pallas as pl
from jax.experimental.pallas import tpu as pltpu

IN_FEATURES = 32 * 32 * 3   # 3072
OUT_FEATURES = 10
OUT_PADDED = 128            # lane-dense output width (multiple of 128)
MAX_TILE_B = 512            # batch tile cap (sized for v7x 64 MiB VMEM)


def _round_up(n, m):
    return ((n + m - 1) // m) * m


def linear_kernel(x_ref, w_ref, b_ref, o_ref):
    # x_ref: (TB, IN) bf16, w_ref: (IN, OUT_PADDED) bf16,
    # b_ref: (1, OUT_PADDED) f32, o_ref: (TB, OUT_PADDED) f32
    acc = jnp.dot(x_ref[...], w_ref[...], preferred_element_type=jnp.float32)
    o_ref[...] = acc + b_ref[...]


@functools.partial(jax.jit, static_argnames=("max_tile_b",))
def basic_net_forward(x, w, b, *, max_tile_b=MAX_TILE_B):
    """BasicNet forward: x @ W.T + b.

    x: (B, 3072) f32
    w: (10, 3072) f32  (PyTorch nn.Linear layout: (out_features, in_features))
    b: (10,) f32
    returns (B, 10) f32
    """
    B = x.shape[0]

    # Batch tile: multiple of 16 (bf16 sublane packing), capped for VMEM.
    TB = min(max_tile_b, _round_up(B, 16))
    B_pad = _round_up(B, TB)

    # Lane-dense, zero-padded weight (transposed) and bias.
    w_t = jnp.zeros((IN_FEATURES, OUT_PADDED), jnp.float32)
    w_t = w_t.at[:, :OUT_FEATURES].set(w.T)
    w_bf16 = w_t.astype(jnp.bfloat16)
    b_pad = jnp.zeros((1, OUT_PADDED), jnp.float32).at[0, :OUT_FEATURES].set(b)

    # bf16 activations (dominant HBM bytes); zero-pad batch to a tile multiple.
    x_pad = jnp.zeros((B_pad, IN_FEATURES), jnp.bfloat16)
    x_pad = x_pad.at[:B].set(x.astype(jnp.bfloat16))

    grid = (B_pad // TB,)
    cost = pl.CostEstimate(
        flops=2 * B_pad * IN_FEATURES * OUT_PADDED,
        transcendentals=0,
        bytes_accessed=(x_pad.size * 2            # bf16 x
                        + w_bf16.size * 2         # bf16 W
                        + b_pad.size * 4          # f32 bias
                        + B_pad * OUT_PADDED * 4  # f32 out
                        ),
    )

    out_padded = pl.pallas_call(
        linear_kernel,
        out_shape=jax.ShapeDtypeStruct((B_pad, OUT_PADDED), jnp.float32),
        grid_spec=pltpu.PrefetchScalarGridSpec(
            num_scalar_prefetch=0,
            grid=grid,
            in_specs=[
                pl.BlockSpec((TB, IN_FEATURES), lambda i: (i, 0)),
                # Weight & bias stay VMEM-resident across batch tiles.
                pl.BlockSpec((IN_FEATURES, OUT_PADDED), lambda i: (0, 0)),
                pl.BlockSpec((1, OUT_PADDED), lambda i: (0, 0)),
            ],
            out_specs=pl.BlockSpec((TB, OUT_PADDED), lambda i: (i, 0)),
        ),
        compiler_params=pltpu.CompilerParams(
            dimension_semantics=("parallel",),  # batch axis -> both TCs on v7x
        ),
        cost_estimate=cost,
    )(x_pad, w_bf16, b_pad)

    # Slice away batch padding and the lane padding of the output head.
    return out_padded[:B, :OUT_FEATURES]


if __name__ == "__main__":
    key = jax.random.PRNGKey(0)
    kx, kw, kb = jax.random.split(key, 3)

    B = 2  # tiny demo batch; kernel pads to a sublane-aligned tile internally
    # Deterministic init mimicking nn.Linear's uniform(-1/sqrt(fan_in), +...)
    bound = 1.0 / jnp.sqrt(jnp.float32(IN_FEATURES))
    w = jax.random.uniform(kw, (OUT_FEATURES, IN_FEATURES), jnp.float32, -bound, bound)
    b = jax.random.uniform(kb, (OUT_FEATURES,), jnp.float32, -bound, bound)
    x = jax.random.normal(kx, (B, IN_FEATURES), jnp.float32)

    out = basic_net_forward(x, w, b)
    jax.block_until_ready(out)

    assert out.shape == (B, OUT_FEATURES)

    # Reference with bf16-rounded inputs (matches kernel math: bf16 MXU, f32 acc)
    x_r = x.astype(jnp.bfloat16).astype(jnp.float32)
    w_r = w.astype(jnp.bfloat16).astype(jnp.float32)
    ref_bf16 = x_r @ w_r.T + b
    assert jnp.allclose(out, ref_bf16, atol=1e-3, rtol=1e-3), "mismatch vs bf16 reference"

    # Full f32 reference (PyTorch semantics) with tolerance for bf16 inputs.
    ref_f32 = x @ w.T + b
    assert jnp.allclose(out, ref_f32, atol=5e-2, rtol=5e-2), "mismatch vs f32 reference"

    print("KERNEL_OK")
</pallas_src>

<mosaic_0001>
module attributes {stable_mosaic.version = 11 : i64} {
  func.func @linear_kernel(%arg0: i32, %arg1: memref<16x3072xbf16, #tpu.memory_space<vmem>>, %arg2: memref<3072x128xbf16, #tpu.memory_space<vmem>>, %arg3: memref<1x128xf32, #tpu.memory_space<vmem>>, %arg4: memref<16x128xf32, #tpu.memory_space<vmem>>) attributes {dimension_semantics = [#tpu.dimension_semantics<parallel>], iteration_bounds = array<i64: 1>, scalar_prefetch = 0 : i64, scratch_operands = 0 : i64, tpu.core_type = #tpu.core_type<tc>, window_params = [{transform_indices = @transform_0, window_bounds = array<i64: 16, 3072>}, {pipeline_mode = #tpu.pipeline_mode<synchronous>, transform_indices = @transform_1, window_bounds = array<i64: 3072, 128>}, {pipeline_mode = #tpu.pipeline_mode<synchronous>, transform_indices = @transform_2, window_bounds = array<i64: 1, 128>}, {transform_indices = @transform_3, window_bounds = array<i64: 16, 128>}]} {
    %c0 = arith.constant 0 : index
    %c0_0 = arith.constant 0 : index
    %0 = vector.load %arg1[%c0, %c0_0] : memref<16x3072xbf16, #tpu.memory_space<vmem>>, vector<16x3072xbf16>
    %c0_1 = arith.constant 0 : index
    %c0_2 = arith.constant 0 : index
    %1 = vector.load %arg2[%c0_1, %c0_2] : memref<3072x128xbf16, #tpu.memory_space<vmem>>, vector<3072x128xbf16>
    %cst = arith.constant dense<0.000000e+00> : vector<16x128xf32>
    %2 = tpu.matmul %0, %1, %cst {dimension_numbers = #tpu.dot_dimension_numbers<[1], [0], [0], [1], [0, 0, 1, 1], [], []>} : vector<16x3072xbf16>, vector<3072x128xbf16>, vector<16x128xf32> -> vector<16x128xf32>
    %c0_3 = arith.constant 0 : index
    %c0_4 = arith.constant 0 : index
    %3 = vector.load %arg3[%c0_3, %c0_4] : memref<1x128xf32, #tpu.memory_space<vmem>>, vector<1x128xf32>
    %4 = vector.broadcast %3 : vector<1x128xf32> to vector<16x128xf32>
    %5 = arith.addf %2, %4 : vector<16x128xf32>
    %c0_5 = arith.constant 0 : index
    %c0_6 = arith.constant 0 : index
    %6 = vector.load %arg4[%c0_5, %c0_6] : memref<16x128xf32, #tpu.memory_space<vmem>>, vector<16x128xf32>
    tpu.vector_store %arg4[%c0_5, %c0_6], %5 {strides = array<i32>} : memref<16x128xf32, #tpu.memory_space<vmem>>, vector<16x128xf32>,
    return
  }
  func.func @transform_0(%arg0: i32) -> (i32, i32) {
    %c0_i32 = arith.constant 0 : i32
    %c0_i32_0 = arith.constant 0 : i32
    return %arg0, %c0_i32 : i32, i32
  }
  func.func @transform_1(%arg0: i32) -> (i32, i32) {
    %c0_i32 = arith.constant 0 : i32
    %c0_i32_0 = arith.constant 0 : i32
    %c0_i32_1 = arith.constant 0 : i32
    return %c0_i32, %c0_i32_0 : i32, i32
  }
  func.func @transform_2(%arg0: i32) -> (i32, i32) {
    %c0_i32 = arith.constant 0 : i32
    %c0_i32_0 = arith.constant 0 : i32
    %c0_i32_1 = arith.constant 0 : i32
    return %c0_i32, %c0_i32_0 : i32, i32
  }
  func.func @transform_3(%arg0: i32) -> (i32, i32) {
    %c0_i32 = arith.constant 0 : i32
    %c0_i32_0 = arith.constant 0 : i32
    return %arg0, %c0_i32 : i32, i32
  }
}

</mosaic_0001>

<bundles_post_ra>
// kernel: basic_net_forward.1
= control target key start
LH: loop header
LB: loop body
LE: loop exit
PB: predicated region body
PF: predicated region fallthrough
CT: control target
= control target key end

     0   :  { %s3550_s1 = inlined_call_operand.vmem [shape: bf16[3072,128], index: 1, kind: input, shape index: {}]   ;;  %s3551_s0 = inlined_call_operand.vmem [shape: bf16[16,3072], index: 0, kind: input, shape index: {}]   ;;  %s3552_s2 = inlined_call_operand.vmem [shape: f32[1,128], index: 2, kind: input, shape index: {}]   ;;  %s3553_s3 = inlined_call_operand.vmem [shape: f32[16,128], index: 3, kind: output, shape index: {}]  }
   0x1   :  { %v2681_v0 = vld [vmem:[%s3550_s1 + $0x40] sm:$0xff]   ;;  %v2685_v4 = vld [vmem:[%s3550_s1 + $0x48] sm:$0xff]   ;;  %v2689_v8 = vld [vmem:[%s3550_s1 + $0x50] sm:$0xff]  }
   0x2   :  { %v2682_v1 = vld [vmem:[%s3550_s1 + $0xc0] sm:$0xff]   ;;  %2417 = vmatprep.subr.bf16.mxu0 %v2681_v0  ;;  %v2686_v5 = vld [vmem:[%s3550_s1 + $0xc8] sm:$0xff]   ;;  %v2690_v9 = vld [vmem:[%s3550_s1 + $0xd0] sm:$0xff]  }
   0x3   :  { %v2683_v2 = vld [vmem:[%s3550_s1] sm:$0xff]   ;;  %2439 = vmatprep.subr.bf16.mxu1 %v2682_v1  ;;  %v2687_v6 = vld [vmem:[%s3550_s1 + $0x8] sm:$0xff]   ;;  %v2691_v10 = vld [vmem:[%s3550_s1 + $0x10] sm:$0xff]  }
   0x4   :  { %v2684_v3 = vld [vmem:[%s3550_s1 + $0x80] sm:$0xff]   ;;  %2418 = vmatpush3.bf16.msra.mxu0 %v2683_v2  ;;  %v2688_v7 = vld [vmem:[%s3550_s1 + $0x88] sm:$0xff]   ;;  %v2692_v11 = vld [vmem:[%s3550_s1 + $0x90] sm:$0xff]  }
   0x5   :  { %2440 = vmatpush3.bf16.msra.mxu1 %v2684_v3  ;;  %2419 = vmatprep.subr.bf16.mxu0 %v2685_v4  ;;  %v2693_v12 = vld [vmem:[%s3550_s1 + $0x58] sm:$0xff]   ;;  %v2697_v16 = vld [vmem:[%s3550_s1 + $0x60] sm:$0xff]   ;;  %v2701_v20 = vld [vmem:[%s3550_s1 + $0x68] sm:$0xff]  }
   0x6   :  { %2441 = vmatprep.subr.bf16.mxu1 %v2686_v5  ;;  %v2694_v13 = vld [vmem:[%s3550_s1 + $0xd8] sm:$0xff]   ;;  %v2698_v17 = vld [vmem:[%s3550_s1 + $0xe0] sm:$0xff]   ;;  %v2702_v21 = vld [vmem:[%s3550_s1 + $0xe8] sm:$0xff]  }
   0x7   :  { %v2695_v14 = vld [vmem:[%s3550_s1 + $0x18] sm:$0xff]   ;;  %v2699_v18 = vld [vmem:[%s3550_s1 + $0x20] sm:$0xff]   ;;  %v2703_v22 = vld [vmem:[%s3550_s1 + $0x28] sm:$0xff]  }
   0x8   :  { %2420 = vmatpush3.bf16.msra.mxu0 %v2687_v6  ;;  %v2696_v15 = vld [vmem:[%s3550_s1 + $0x98] sm:$0xff]   ;;  %v2700_v19 = vld [vmem:[%s3550_s1 + $0xa0] sm:$0xff]   ;;  %v2704_v23 = vld [vmem:[%s3550_s1 + $0xa8] sm:$0xff]  }
   0x9   :  { %2442 = vmatpush3.bf16.msra.mxu1 %v2688_v7  ;;  %2421 = vmatprep.subr.bf16.mxu0 %v2689_v8  ;;  %v2705_v24 = vld [vmem:[%s3550_s1 + $0x70] sm:$0xff]   ;;  %v2709_v28 = vld [vmem:[%s3550_s1 + $0x78] sm:$0xff]   ;;  %v15_v32 = vld [vmem:[%s3551_s0] sm:$0xff] }
   0xa   :  { %2443 = vmatprep.subr.bf16.mxu1 %v2690_v9  ;;  %v2706_v25 = vld [vmem:[%s3550_s1 + $0xf0] sm:$0xff]   ;;  %v2710_v29 = vld [vmem:[%s3550_s1 + $0xf8] sm:$0xff]   ;;  %v27_v33 = vld [vmem:[%s3551_s0 + $0x60] sm:$0xff] }
   0xb   :  { %v2707_v26 = vld [vmem:[%s3550_s1 + $0x30] sm:$0xff]   ;;  %v2711_v30 = vld [vmem:[%s3550_s1 + $0x38] sm:$0xff]   ;;  %v16_v34 = vld [vmem:[%s3551_s0 + $0x8] sm:$0xff]  ;;  %v2201_v35 = vcombine.low %v15_v32, %v27_v33  ;;  %v2202_v36 = vcombine.high %v15_v32, %v27_v33 }
   0xc   :  { %2422 = vmatpush3.bf16.msra.mxu0 %v2691_v10  ;;  %v2708_v27 = vld [vmem:[%s3550_s1 + $0xb0] sm:$0xff]   ;;  %v2712_v31 = vld [vmem:[%s3550_s1 + $0xb8] sm:$0xff]   ;;  %v28_v37 = vld [vmem:[%s3551_s0 + $0x68] sm:$0xff] }
   0xd   :  { %2444 = vmatpush3.bf16.msra.mxu1 %v2692_v11  ;;  %2423 = vmatprep.subr.bf16.mxu0 %v2693_v12  ;;  %v2203_v38 = vcombine.low %v16_v34, %v28_v37  ;;  %v2204_v39 = vcombine.high %v16_v34, %v28_v37  ;;  %v2713_v40 = vld [vmem:[%s3550_s1 + $0x140] sm:$0xff]   ;;  %v2717_v44 = vld [vmem:[%s3550_s1 + $0x148] sm:$0xff]   ;;  %v2721_v48 = vld [vmem:[%s3550_s1 + $0x150] sm:$0xff]  }
   0xe   :  { %2445 = vmatprep.subr.bf16.mxu1 %v2694_v13  ;;  %1734 = vmatprep.mubr.bf16.mxu0 %v2202_v36  ;;  %v2714_v41 = vld [vmem:[%s3550_s1 + $0x1c0] sm:$0xff]   ;;  %v2718_v45 = vld [vmem:[%s3550_s1 + $0x1c8] sm:$0xff]   ;;  %v2722_v49 = vld [vmem:[%s3550_s1 + $0x1d0] sm:$0xff]  }
   0xf   :  { %1775 = vmatprep.mubr.bf16.mxu1 %v2204_v39  ;;  %v2715_v42 = vld [vmem:[%s3550_s1 + $0x100] sm:$0xff]   ;;  %v2719_v46 = vld [vmem:[%s3550_s1 + $0x108] sm:$0xff]   ;;  %v2723_v50 = vld [vmem:[%s3550_s1 + $0x110] sm:$0xff]  }
  0x10   :  { %2424 = vmatpush3.bf16.msra.mxu0 %v2695_v14  ;;  %v2716_v43 = vld [vmem:[%s3550_s1 + $0x180] sm:$0xff]   ;;  %v2720_v47 = vld [vmem:[%s3550_s1 + $0x188] sm:$0xff]   ;;  %v2724_v51 = vld [vmem:[%s3550_s1 + $0x190] sm:$0xff]  }
  0x11   :  { %2446 = vmatpush3.bf16.msra.mxu1 %v2696_v15  ;;  %2425 = vmatprep.subr.bf16.mxu0 %v2697_v16  ;;  %v2725_v52 = vld [vmem:[%s3550_s1 + $0x158] sm:$0xff]   ;;  %v2729_v56 = vld [vmem:[%s3550_s1 + $0x160] sm:$0xff]   ;;  %v2733_v60 = vld [vmem:[%s3550_s1 + $0x168] sm:$0xff]  }
  0x12   :  { %2447 = vmatprep.subr.bf16.mxu1 %v2698_v17  ;;  %v2726_v53 = vld [vmem:[%s3550_s1 + $0x1d8] sm:$0xff]   ;;  %v2730_v57 = vld [vmem:[%s3550_s1 + $0x1e0] sm:$0xff]   ;;  %v2734_v61 = vld [vmem:[%s3550_s1 + $0x1e8] sm:$0xff]  }
  0x13   :  { %v2727_v54 = vld [vmem:[%s3550_s1 + $0x118] sm:$0xff]   ;;  %v2731_v58 = vld [vmem:[%s3550_s1 + $0x120] sm:$0xff]   ;;  %v2735_v62 = vld [vmem:[%s3550_s1 + $0x128] sm:$0xff]  }
  0x14   :  { %2426 = vmatpush3.bf16.msra.mxu0 %v2699_v18  ;;  %v2728_v55 = vld [vmem:[%s3550_s1 + $0x198] sm:$0xff]   ;;  %v2732_v59 = vld [vmem:[%s3550_s1 + $0x1a0] sm:$0xff]   ;;  %v2736_v63 = vld [vmem:[%s3550_s1 + $0x1a8] sm:$0xff]  }
  0x15   :  { %2448 = vmatpush3.bf16.msra.mxu1 %v2700_v19  ;;  %2427 = vmatprep.subr.bf16.mxu0 %v2701_v20  ;;  %v2737_v0 = vld [vmem:[%s3550_s1 + $0x170] sm:$0xff]   ;;  %v2741_v4 = vld [vmem:[%s3550_s1 + $0x178] sm:$0xff]   ;;  %v2745_v16 = vld [vmem:[%s3550_s1 + $0x240] sm:$0xff]  }
  0x16   :  { %2449 = vmatprep.subr.bf16.mxu1 %v2702_v21  ;;  %v2738_v1 = vld [vmem:[%s3550_s1 + $0x1f0] sm:$0xff]   ;;  %v2742_v5 = vld [vmem:[%s3550_s1 + $0x1f8] sm:$0xff]   ;;  %v2746_v17 = vld [vmem:[%s3550_s1 + $0x2c0] sm:$0xff]  }
  0x17   :  { %v2739_v2 = vld [vmem:[%s3550_s1 + $0x130] sm:$0xff]   ;;  %v2743_v6 = vld [vmem:[%s3550_s1 + $0x138] sm:$0xff]   ;;  %v2747_v18 = vld [vmem:[%s3550_s1 + $0x200] sm:$0xff]  }
  0x18   :  { %2428 = vmatpush3.bf16.msra.mxu0 %v2703_v22  ;;  %v2740_v3 = vld [vmem:[%s3550_s1 + $0x1b0] sm:$0xff]   ;;  %v2744_v7 = vld [vmem:[%s3550_s1 + $0x1b8] sm:$0xff]   ;;  %v2748_v19 = vld [vmem:[%s3550_s1 + $0x280] sm:$0xff]  }
  0x19   :  { %2450 = vmatpush3.bf16.msra.mxu1 %v2704_v23  ;;  %2429 = vmatprep.subr.bf16.mxu0 %v2705_v24  ;;  %v17_v8 = vld [vmem:[%s3551_s0 + $0x10] sm:$0xff]  ;;  %v18_v12 = vld [vmem:[%s3551_s0 + $0x18] sm:$0xff]  ;;  %v2749_v20 = vld [vmem:[%s3550_s1 + $0x248] sm:$0xff]  }
  0x1a   :  { %2451 = vmatprep.subr.bf16.mxu1 %v2706_v25  ;;  %v29_v9 = vld [vmem:[%s3551_s0 + $0x70] sm:$0xff]  ;;  %v30_v13 = vld [vmem:[%s3551_s0 + $0x78] sm:$0xff]  ;;  %v2750_v21 = vld [vmem:[%s3550_s1 + $0x2c8] sm:$0xff]  }
  0x1b   :  { %v2205_v10 = vcombine.low %v17_v8, %v29_v9  ;;  %v2206_v11 = vcombine.high %v17_v8, %v29_v9  ;;  %v2207_v14 = vcombine.low %v18_v12, %v30_v13  ;;  %v2208_v15 = vcombine.high %v18_v12, %v30_v13  ;;  %v2751_v22 = vld [vmem:[%s3550_s1 + $0x208] sm:$0xff]   ;;  %v2753_v24 = vld [vmem:[%s3550_s1 + $0x250] sm:$0xff]   ;;  %v2761_v32 = vld [vmem:[%s3550_s1 + $0x260] sm:$0xff]  }
  0x1c   :  { %2430 = vmatpush3.bf16.msra.mxu0 %v2707_v26  ;;  %v2752_v23 = vld [vmem:[%s3550_s1 + $0x288] sm:$0xff]   ;;  %v2754_v25 = vld [vmem:[%s3550_s1 + $0x2d0] sm:$0xff]   ;;  %v2762_v33 = vld [vmem:[%s3550_s1 + $0x2e0] sm:$0xff]  }
  0x1d   :  { %2452 = vmatpush3.bf16.msra.mxu1 %v2708_v27  ;;  %2431 = vmatprep.subr.bf16.mxu0 %v2709_v28  ;;  %v2755_v26 = vld [vmem:[%s3550_s1 + $0x210] sm:$0xff]   ;;  %v2757_v28 = vld [vmem:[%s3550_s1 + $0x258] sm:$0xff]   ;;  %v2763_v34 = vld [vmem:[%s3550_s1 + $0x220] sm:$0xff]  }
  0x1e   :  { %2453 = vmatprep.subr.bf16.mxu1 %v2710_v29  ;;  %v2756_v27 = vld [vmem:[%s3550_s1 + $0x290] sm:$0xff]   ;;  %v2758_v29 = vld [vmem:[%s3550_s1 + $0x2d8] sm:$0xff]   ;;  %v2765_v36 = vld [vmem:[%s3550_s1 + $0x268] sm:$0xff]  }
  0x1f   :  { %v2766_v37 = vld [vmem:[%s3550_s1 + $0x2e8] sm:$0xff]   ;;  %v2793_v8 = vld [vmem:[%s3550_s1 + $0x360] sm:$0xff]  }
  0x20   :  { %2432 = vmatpush3.bf16.msra.mxu0 %v2711_v30  ;;  %v2759_v30 = vld [vmem:[%s3550_s1 + $0x218] sm:$0xff]   ;;  %v2768_v39 = vld [vmem:[%s3550_s1 + $0x2a8] sm:$0xff]   ;;  %v2794_v9 = vld [vmem:[%s3550_s1 + $0x3e0] sm:$0xff]  }
  0x21   :  { %2454 = vmatpush3.bf16.msra.mxu1 %v2712_v31  ;;  %2461 = vmatprep.subr.bf16.mxu0 %v2713_v40  ;;  %v2760_v31 = vld [vmem:[%s3550_s1 + $0x298] sm:$0xff]   ;;  %v2769_v40 = vld [vmem:[%s3550_s1 + $0x270] sm:$0xff]   ;;  %v2797_v12 = vld [vmem:[%s3550_s1 + $0x368] sm:$0xff]  }
  0x22   :  { %2483 = vmatprep.subr.bf16.mxu1 %v2714_v41  ;;  %v2770_v41 = vld [vmem:[%s3550_s1 + $0x2f0] sm:$0xff]   ;;  %v2798_v13 = vld [vmem:[%s3550_s1 + $0x3e8] sm:$0xff]  }
  0x23   :  { %1735 = vmatmul.mubr.bf16.vlgmr.msra.gmra.mrb[0].mxu0 %v2201_v35  ;;  %v2764_v35 = vld [vmem:[%s3550_s1 + $0x2a0] sm:$0xff]  }
  0x24   :  { %1776 = vmatmul.mubr.bf16.vlgmr.msra.gmra.mrb[0].mxu1 %v2203_v38  ;;  %2462 = vmatpush3.bf16.msra.mxu0 %v2715_v42  ;;  %v2767_v38 = vld [vmem:[%s3550_s1 + $0x228] sm:$0xff]   ;;  %v2771_v42 = vld [vmem:[%s3550_s1 + $0x230] sm:$0xff]  }
  0x25   :  { %2484 = vmatpush3.bf16.msra.mxu1 %v2716_v43  ;;  %2463 = vmatprep.subr.bf16.mxu0 %v2717_v44  ;;  %v2772_v43 = vld [vmem:[%s3550_s1 + $0x2b0] sm:$0xff]   ;;  %v2773_v44 = vld [vmem:[%s3550_s1 + $0x278] sm:$0xff]  }
  0x26   :  { %2485 = vmatprep.subr.bf16.mxu1 %v2718_v45  ;;  %1816 = vmatprep.mubr.bf16.mxu0 %v2206_v11  ;;  %v2774_v45 = vld [vmem:[%s3550_s1 + $0x2f8] sm:$0xff]   ;;  %v2796_v11 = vld [vmem:[%s3550_s1 + $0x3a0] sm:$0xff]  }
  0x27   :  { %1857 = vmatprep.mubr.bf16.mxu1 %v2208_v15  ;;  %v2800_v15 = vld [vmem:[%s3550_s1 + $0x3a8] sm:$0xff]  }
  0x28   :  { %2464 = vmatpush3.bf16.msra.mxu0 %v2719_v46  ;;  %v2775_v46 = vld [vmem:[%s3550_s1 + $0x238] sm:$0xff]  }
  0x29   :  { %2486 = vmatpush3.bf16.msra.mxu1 %v2720_v47  ;;  %2465 = vmatprep.subr.bf16.mxu0 %v2721_v48  ;;  %v2776_v47 = vld [vmem:[%s3550_s1 + $0x2b8] sm:$0xff]   ;;  %v19_v48 = vld [vmem:[%s3551_s0 + $0x20] sm:$0xff] }
  0x2a   :  { %2487 = vmatprep.subr.bf16.mxu1 %v2722_v49  ;;  %v31_v49 = vld [vmem:[%s3551_s0 + $0x80] sm:$0xff] }
  0x2c   :  { %2466 = vmatpush3.bf16.msra.mxu0 %v2723_v50  ;;  %v20_v50 = vld [vmem:[%s3551_s0 + $0x28] sm:$0xff] }
  0x2d   :  { %2488 = vmatpush3.bf16.msra.mxu1 %v2724_v51  ;;  %2467 = vmatprep.subr.bf16.mxu0 %v2725_v52  ;;  %v32_v51 = vld [vmem:[%s3551_s0 + $0x88] sm:$0xff]  ;;  %v2209_v52 = vcombine.low %v19_v48, %v31_v49 }
  0x2e   :  { %2489 = vmatprep.subr.bf16.mxu1 %v2726_v53  ;;  %v2210_v53 = vcombine.high %v19_v48, %v31_v49  ;;  %v2825_v48 = vld [vmem:[%s3550_s1 + $0x460] sm:$0xff]  }
  0x2f   :  { %v2826_v49 = vld [vmem:[%s3550_s1 + $0x4e0] sm:$0xff]  }
  0x30   :  { %2468 = vmatpush3.bf16.msra.mxu0 %v2727_v54  ;;  %v2211_v54 = vcombine.low %v20_v50, %v32_v51 }
  0x31   :  { %2490 = vmatpush3.bf16.msra.mxu1 %v2728_v55  ;;  %2469 = vmatprep.subr.bf16.mxu0 %v2729_v56  ;;  %v2212_v55 = vcombine.high %v20_v50, %v32_v51  ;;  %v2777_v56 = vld [vmem:[%s3550_s1 + $0x340] sm:$0xff]  }
  0x32   :  { %2491 = vmatprep.subr.bf16.mxu1 %v2730_v57  ;;  %v2778_v57 = vld [vmem:[%s3550_s1 + $0x3c0] sm:$0xff]  }
  0x33   :  { %v2827_v50 = vld [vmem:[%s3550_s1 + $0x420] sm:$0xff]  }
  0x34   :  { %2470 = vmatpush3.bf16.msra.mxu0 %v2731_v58  ;;  %v2779_v58 = vld [vmem:[%s3550_s1 + $0x300] sm:$0xff]  }
  0x35   :  { %2492 = vmatpush3.bf16.msra.mxu1 %v2732_v59  ;;  %2471 = vmatprep.subr.bf16.mxu0 %v2733_v60  ;;  %v2780_v59 = vld [vmem:[%s3550_s1 + $0x380] sm:$0xff]   ;;  %v2781_v60 = vld [vmem:[%s3550_s1 + $0x348] sm:$0xff]  }
  0x36   :  { %2493 = vmatprep.subr.bf16.mxu1 %v2734_v61  ;;  %v2782_v61 = vld [vmem:[%s3550_s1 + $0x3c8] sm:$0xff]   ;;  %v2828_v51 = vld [vmem:[%s3550_s1 + $0x4a0] sm:$0xff]  }
  0x38   :  { %2472 = vmatpush3.bf16.msra.mxu0 %v2735_v62  ;;  %v2783_v62 = vld [vmem:[%s3550_s1 + $0x308] sm:$0xff]  }
  0x39   :  { %2494 = vmatpush3.bf16.msra.mxu1 %v2736_v63  ;;  %2473 = vmatprep.subr.bf16.mxu0 %v2737_v0  ;;  %v2784_v63 = vld [vmem:[%s3550_s1 + $0x388] sm:$0xff]   ;;  %v2785_v0 = vld [vmem:[%s3550_s1 + $0x350] sm:$0xff]  }
  0x3a   :  { %2495 = vmatprep.subr.bf16.mxu1 %v2738_v1  ;;  %v2786_v1 = vld [vmem:[%s3550_s1 + $0x3d0] sm:$0xff]  }
  0x3c   :  { %2474 = vmatpush3.bf16.msra.mxu0 %v2739_v2  ;;  %v2787_v2 = vld [vmem:[%s3550_s1 + $0x310] sm:$0xff]  }
  0x3d   :  { %2496 = vmatpush3.bf16.msra.mxu1 %v2740_v3  ;;  %2475 = vmatprep.subr.bf16.mxu0 %v2741_v4  ;;  %v2788_v3 = vld [vmem:[%s3550_s1 + $0x390] sm:$0xff]   ;;  %v2789_v4 = vld [vmem:[%s3550_s1 + $0x358] sm:$0xff]  }
  0x3e   :  { %2497 = vmatprep.subr.bf16.mxu1 %v2742_v5  ;;  %v2790_v5 = vld [vmem:[%s3550_s1 + $0x3d8] sm:$0xff]  }
  0x40   :  { %2476 = vmatpush3.bf16.msra.mxu0 %v2743_v6  ;;  %v2791_v6 = vld [vmem:[%s3550_s1 + $0x318] sm:$0xff]  }
  0x41   :  { %2498 = vmatpush3.bf16.msra.mxu1 %v2744_v7  ;;  %2505 = vmatprep.subr.bf16.mxu0 %v2745_v16  ;;  %v2792_v7 = vld [vmem:[%s3550_s1 + $0x398] sm:$0xff]   ;;  %v2801_v16 = vld [vmem:[%s3550_s1 + $0x370] sm:$0xff]  }
  0x42   :  { %2527 = vmatprep.subr.bf16.mxu1 %v2746_v17  ;;  %v2802_v17 = vld [vmem:[%s3550_s1 + $0x3f0] sm:$0xff]  }
  0x43   :  { %1817 = vmatmul.mubr.bf16.vlgmr.msra.gmra.mrb[4].mxu0 %v2205_v10  ;;  %v2795_v10 = vld [vmem:[%s3550_s1 + $0x320] sm:$0xff]  }
  0x44   :  { %1858 = vmatmul.mubr.bf16.vlgmr.msra.gmra.mrb[4].mxu1 %v2207_v14  ;;  %2506 = vmatpush3.bf16.msra.mxu0 %v2747_v18  ;;  %v2799_v14 = vld [vmem:[%s3550_s1 + $0x328] sm:$0xff]   ;;  %v2803_v18 = vld [vmem:[%s3550_s1 + $0x330] sm:$0xff]  }
  0x45   :  { %2528 = vmatpush3.bf16.msra.mxu1 %v2748_v19  ;;  %2507 = vmatprep.subr.bf16.mxu0 %v2749_v20  ;;  %v2804_v19 = vld [vmem:[%s3550_s1 + $0x3b0] sm:$0xff]   ;;  %v2805_v20 = vld [vmem:[%s3550_s1 + $0x378] sm:$0xff]  }
  0x46   :  { %2529 = vmatprep.subr.bf16.mxu1 %v2750_v21  ;;  %1898 = vmatprep.mubr.bf16.mxu0 %v2210_v53  ;;  %v2806_v21 = vld [vmem:[%s3550_s1 + $0x3f8] sm:$0xff]   ;;  %v2830_v53 = vld [vmem:[%s3550_s1 + $0x4e8] sm:$0xff]  }
  0x47   :  { %1939 = vmatprep.mubr.bf16.mxu1 %v2212_v55  ;;  %v2832_v55 = vld [vmem:[%s3550_s1 + $0x4a8] sm:$0xff]  }
  0x48   :  { %2508 = vmatpush3.bf16.msra.mxu0 %v2751_v22  ;;  %v2807_v22 = vld [vmem:[%s3550_s1 + $0x338] sm:$0xff]  }
  0x49   :  { %2530 = vmatpush3.bf16.msra.mxu1 %v2752_v23  ;;  %2509 = vmatprep.subr.bf16.mxu0 %v2753_v24  ;;  %v2808_v23 = vld [vmem:[%s3550_s1 + $0x3b8] sm:$0xff]   ;;  %v21_v24 = vld [vmem:[%s3551_s0 + $0x30] sm:$0xff] }
  0x4a   :  { %2531 = vmatprep.subr.bf16.mxu1 %v2754_v25  ;;  %v33_v25 = vld [vmem:[%s3551_s0 + $0x90] sm:$0xff] }
  0x4c   :  { %2510 = vmatpush3.bf16.msra.mxu0 %v2755_v26  ;;  %v22_v26 = vld [vmem:[%s3551_s0 + $0x38] sm:$0xff] }
  0x4d   :  { %2532 = vmatpush3.bf16.msra.mxu1 %v2756_v27  ;;  %2511 = vmatprep.subr.bf16.mxu0 %v2757_v28  ;;  %v2213_v27 = vcombine.low %v21_v24, %v33_v25  ;;  %v2214_v28 = vcombine.high %v21_v24, %v33_v25  ;;  %v2857_v24 = vld [vmem:[%s3550_s1 + $0x560] sm:$0xff]  }
  0x4e   :  { %2533 = vmatprep.subr.bf16.mxu1 %v2758_v29  ;;  %v34_v29 = vld [vmem:[%s3551_s0 + $0x98] sm:$0xff]  ;;  %v2858_v25 = vld [vmem:[%s3550_s1 + $0x5e0] sm:$0xff]  }
  0x50   :  { %2512 = vmatpush3.bf16.msra.mxu0 %v2759_v30  ;;  %v2215_v30 = vcombine.low %v22_v26, %v34_v29 }
  0x51   :  { %2534 = vmatpush3.bf16.msra.mxu1 %v2760_v31  ;;  %2513 = vmatprep.subr.bf16.mxu0 %v2761_v32  ;;  %v2216_v31 = vcombine.high %v22_v26, %v34_v29  ;;  %v2809_v32 = vld [vmem:[%s3550_s1 + $0x440] sm:$0xff]   ;;  %v2862_v29 = vld [vmem:[%s3550_s1 + $0x5e8] sm:$0xff]  }
  0x52   :  { %2535 = vmatprep.subr.bf16.mxu1 %v2762_v33  ;;  %v2810_v33 = vld [vmem:[%s3550_s1 + $0x4c0] sm:$0xff]  }
  0x53   :  { %v2859_v26 = vld [vmem:[%s3550_s1 + $0x520] sm:$0xff]  }
  0x54   :  { %2514 = vmatpush3.bf16.msra.mxu0 %v2763_v34  ;;  %v2811_v34 = vld [vmem:[%s3550_s1 + $0x400] sm:$0xff]  }
  0x55   :  { %2536 = vmatpush3.bf16.msra.mxu1 %v2764_v35  ;;  %2515 = vmatprep.subr.bf16.mxu0 %v2765_v36  ;;  %v2812_v35 = vld [vmem:[%s3550_s1 + $0x480] sm:$0xff]   ;;  %v2813_v36 = vld [vmem:[%s3550_s1 + $0x448] sm:$0xff]  }
  0x56   :  { %2537 = vmatprep.subr.bf16.mxu1 %v2766_v37  ;;  %v2814_v37 = vld [vmem:[%s3550_s1 + $0x4c8] sm:$0xff]  }
  0x58   :  { %2516 = vmatpush3.bf16.msra.mxu0 %v2767_v38  ;;  %v2815_v38 = vld [vmem:[%s3550_s1 + $0x408] sm:$0xff]  }
  0x59   :  { %2538 = vmatpush3.bf16.msra.mxu1 %v2768_v39  ;;  %2517 = vmatprep.subr.bf16.mxu0 %v2769_v40  ;;  %v2816_v39 = vld [vmem:[%s3550_s1 + $0x488] sm:$0xff]   ;;  %v2817_v40 = vld [vmem:[%s3550_s1 + $0x450] sm:$0xff]  }
  0x5a   :  { %2539 = vmatprep.subr.bf16.mxu1 %v2770_v41  ;;  %v2818_v41 = vld [vmem:[%s3550_s1 + $0x4d0] sm:$0xff]  }
  0x5c   :  { %2518 = vmatpush3.bf16.msra.mxu0 %v2771_v42  ;;  %v2819_v42 = vld [vmem:[%s3550_s1 + $0x410] sm:$0xff]  }
  0x5d   :  { %2540 = vmatpush3.bf16.msra.mxu1 %v2772_v43  ;;  %2519 = vmatprep.subr.bf16.mxu0 %v2773_v44  ;;  %v2820_v43 = vld [vmem:[%s3550_s1 + $0x490] sm:$0xff]   ;;  %v2821_v44 = vld [vmem:[%s3550_s1 + $0x458] sm:$0xff]  }
  0x5e   :  { %2541 = vmatprep.subr.bf16.mxu1 %v2774_v45  ;;  %v2822_v45 = vld [vmem:[%s3550_s1 + $0x4d8] sm:$0xff]  }
  0x60   :  { %2520 = vmatpush3.bf16.msra.mxu0 %v2775_v46  ;;  %v2823_v46 = vld [vmem:[%s3550_s1 + $0x418] sm:$0xff]  }
  0x61   :  { %2542 = vmatpush3.bf16.msra.mxu1 %v2776_v47  ;;  %2549 = vmatprep.subr.bf16.mxu0 %v2777_v56  ;;  %v2824_v47 = vld [vmem:[%s3550_s1 + $0x498] sm:$0xff]   ;;  %v2833_v56 = vld [vmem:[%s3550_s1 + $0x470] sm:$0xff]  }
  0x62   :  { %2571 = vmatprep.subr.bf16.mxu1 %v2778_v57  ;;  %v2834_v57 = vld [vmem:[%s3550_s1 + $0x4f0] sm:$0xff]  }
  0x63   :  { %1899 = vmatmul.mubr.bf16.vlgmr.msra.gmra.mrb[8].mxu0 %v2209_v52  ;;  %v2829_v52 = vld [vmem:[%s3550_s1 + $0x468] sm:$0xff]  }
  0x64   :  { %1940 = vmatmul.mubr.bf16.vlgmr.msra.gmra.mrb[8].mxu1 %v2211_v54  ;;  %2550 = vmatpush3.bf16.msra.mxu0 %v2779_v58  ;;  %v2831_v54 = vld [vmem:[%s3550_s1 + $0x428] sm:$0xff]   ;;  %v2835_v58 = vld [vmem:[%s3550_s1 + $0x430] sm:$0xff]  }
  0x65   :  { %2572 = vmatpush3.bf16.msra.mxu1 %v2780_v59  ;;  %2551 = vmatprep.subr.bf16.mxu0 %v2781_v60  ;;  %v2836_v59 = vld [vmem:[%s3550_s1 + $0x4b0] sm:$0xff]   ;;  %v2837_v60 = vld [vmem:[%s3550_s1 + $0x478] sm:$0xff]  }
  0x66   :  { %2573 = vmatprep.subr.bf16.mxu1 %v2782_v61  ;;  %1980 = vmatprep.mubr.bf16.mxu0 %v2214_v28  ;;  %v2838_v61 = vld [vmem:[%s3550_s1 + $0x4f8] sm:$0xff]   ;;  %v2861_v28 = vld [vmem:[%s3550_s1 + $0x568] sm:$0xff]  }
  0x67   :  { %2021 = vmatprep.mubr.bf16.mxu1 %v2216_v31  ;;  %v2864_v31 = vld [vmem:[%s3550_s1 + $0x5a8] sm:$0xff]  }
  0x68   :  { %2552 = vmatpush3.bf16.msra.mxu0 %v2783_v62  ;;  %v2839_v62 = vld [vmem:[%s3550_s1 + $0x438] sm:$0xff]  }
  0x69   :  { %2574 = vmatpush3.bf16.msra.mxu1 %v2784_v63  ;;  %2553 = vmatprep.subr.bf16.mxu0 %v2785_v0  ;;  %v2840_v63 = vld [vmem:[%s3550_s1 + $0x4b8] sm:$0xff]   ;;  %v23_v0 = vld [vmem:[%s3551_s0 + $0x40] sm:$0xff] }
  0x6a   :  { %2575 = vmatprep.subr.bf16.mxu1 %v2786_v1  ;;  %v35_v1 = vld [vmem:[%s3551_s0 + $0xa0] sm:$0xff] }
  0x6c   :  { %2554 = vmatpush3.bf16.msra.mxu0 %v2787_v2  ;;  %v2217_v2 = vcombine.low %v23_v0, %v35_v1 }
  0x6d   :  { %2576 = vmatpush3.bf16.msra.mxu1 %v2788_v3  ;;  %2555 = vmatprep.subr.bf16.mxu0 %v2789_v4  ;;  %v2218_v3 = vcombine.high %v23_v0, %v35_v1  ;;  %v24_v4 = vld [vmem:[%s3551_s0 + $0x48] sm:$0xff] }
  0x6e   :  { %2577 = vmatprep.subr.bf16.mxu1 %v2790_v5  ;;  %v36_v5 = vld [vmem:[%s3551_s0 + $0xa8] sm:$0xff] }
  0x70   :  { %2556 = vmatpush3.bf16.msra.mxu0 %v2791_v6  ;;  %v2219_v6 = vcombine.low %v24_v4, %v36_v5 }
  0x71   :  { %2578 = vmatpush3.bf16.msra.mxu1 %v2792_v7  ;;  %2557 = vmatprep.subr.bf16.mxu0 %v2793_v8  ;;  %v2220_v7 = vcombine.high %v24_v4, %v36_v5  ;;  %v2841_v8 = vld [vmem:[%s3550_s1 + $0x540] sm:$0xff]  }
  0x72   :  { %2579 = vmatprep.subr.bf16.mxu1 %v2794_v9  ;;  %v2842_v9 = vld [vmem:[%s3550_s1 + $0x5c0] sm:$0xff]  }
  0x74   :  { %2558 = vmatpush3.bf16.msra.mxu0 %v2795_v10  ;;  %v2843_v10 = vld [vmem:[%s3550_s1 + $0x500] sm:$0xff]  }
  0x75   :  { %2580 = vmatpush3.bf16.msra.mxu1 %v2796_v11  ;;  %2559 = vmatprep.subr.bf16.mxu0 %v2797_v12  ;;  %v2844_v11 = vld [vmem:[%s3550_s1 + $0x580] sm:$0xff]   ;;  %v2845_v12 = vld [vmem:[%s3550_s1 + $0x548] sm:$0xff]  }
  0x76   :  { %2581 = vmatprep.subr.bf16.mxu1 %v2798_v13  ;;  %v2846_v13 = vld [vmem:[%s3550_s1 + $0x5c8] sm:$0xff]  }
  0x78   :  { %2560 = vmatpush3.bf16.msra.mxu0 %v2799_v14  ;;  %v2847_v14 = vld [vmem:[%s3550_s1 + $0x508] sm:$0xff]  }
  0x79   :  { %2582 = vmatpush3.bf16.msra.mxu1 %v2800_v15  ;;  %2561 = vmatprep.subr.bf16.mxu0 %v2801_v16  ;;  %v2848_v15 = vld [vmem:[%s3550_s1 + $0x588] sm:$0xff]   ;;  %v2849_v16 = vld [vmem:[%s3550_s1 + $0x550] sm:$0xff]  }
  0x7a   :  { %2583 = vmatprep.subr.bf16.mxu1 %v2802_v17  ;;  %v2850_v17 = vld [vmem:[%s3550_s1 + $0x5d0] sm:$0xff]  }
  0x7c   :  { %2562 = vmatpush3.bf16.msra.mxu0 %v2803_v18  ;;  %v2851_v18 = vld [vmem:[%s3550_s1 + $0x510] sm:$0xff]  }
  0x7d   :  { %2584 = vmatpush3.bf16.msra.mxu1 %v2804_v19  ;;  %2563 = vmatprep.subr.bf16.mxu0 %v2805_v20  ;;  %v2852_v19 = vld [vmem:[%s3550_s1 + $0x590] sm:$0xff]   ;;  %v2853_v20 = vld [vmem:[%s3550_s1 + $0x558] sm:$0xff]  }
  0x7e   :  { %2585 = vmatprep.subr.bf16.mxu1 %v2806_v21  ;;  %v2854_v21 = vld [vmem:[%s3550_s1 + $0x5d8] sm:$0xff]  }
  0x80   :  { %2564 = vmatpush3.bf16.msra.mxu0 %v2807_v22  ;;  %v2855_v22 = vld [vmem:[%s3550_s1 + $0x518] sm:$0xff]  }
  0x81   :  { %2586 = vmatpush3.bf16.msra.mxu1 %v2808_v23  ;;  %2593 = vmatprep.subr.bf16.mxu0 %v2809_v32  ;;  %v2856_v23 = vld [vmem:[%s3550_s1 + $0x598] sm:$0xff]   ;;  %v2865_v32 = vld [vmem:[%s3550_s1 + $0x570] sm:$0xff]  }
  0x82   :  { %2615 = vmatprep.subr.bf16.mxu1 %v2810_v33  ;;  %v2866_v33 = vld [vmem:[%s3550_s1 + $0x5f0] sm:$0xff]  }
  0x83   :  { %1981 = vmatmul.mubr.bf16.vlgmr.msra.gmra.mrb[12].mxu0 %v2213_v27  ;;  %v2860_v27 = vld [vmem:[%s3550_s1 + $0x5a0] sm:$0xff]  }
  0x84   :  { %2022 = vmatmul.mubr.bf16.vlgmr.msra.gmra.mrb[12].mxu1 %v2215_v30  ;;  %2594 = vmatpush3.bf16.msra.mxu0 %v2811_v34  ;;  %v2863_v30 = vld [vmem:[%s3550_s1 + $0x528] sm:$0xff]   ;;  %v2867_v34 = vld [vmem:[%s3550_s1 + $0x530] sm:$0xff]  }
  0x85   :  { %2616 = vmatpush3.bf16.msra.mxu1 %v2812_v35  ;;  %2595 = vmatprep.subr.bf16.mxu0 %v2813_v36  ;;  %v2868_v35 = vld [vmem:[%s3550_s1 + $0x5b0] sm:$0xff]   ;;  %v2869_v36 = vld [vmem:[%s3550_s1 + $0x578] sm:$0xff]  }
  0x86   :  { %2617 = vmatprep.subr.bf16.mxu1 %v2814_v37  ;;  %2062 = vmatprep.mubr.bf16.mxu0 %v2218_v3  ;;  %v2870_v37 = vld [vmem:[%s3550_s1 + $0x5f8] sm:$0xff]  }
  0x87   :  { %2103 = vmatprep.mubr.bf16.mxu1 %v2220_v7 }
  0x88   :  { %2596 = vmatpush3.bf16.msra.mxu0 %v2815_v38  ;;  %v2871_v38 = vld [vmem:[%s3550_s1 + $0x538] sm:$0xff]  }
  0x89   :  { %2618 = vmatpush3.bf16.msra.mxu1 %v2816_v39  ;;  %2597 = vmatprep.subr.bf16.mxu0 %v2817_v40  ;;  %v2872_v39 = vld [vmem:[%s3550_s1 + $0x5b8] sm:$0xff]   ;;  %v25_v40 = vld [vmem:[%s3551_s0 + $0x50] sm:$0xff] }
  0x8a   :  { %2619 = vmatprep.subr.bf16.mxu1 %v2818_v41  ;;  %v37_v41 = vld [vmem:[%s3551_s0 + $0xb0] sm:$0xff] }
  0x8c   :  { %2598 = vmatpush3.bf16.msra.mxu0 %v2819_v42  ;;  %v26_v42 = vld [vmem:[%s3551_s0 + $0x58] sm:$0xff] }
  0x8d   :  { %2620 = vmatpush3.bf16.msra.mxu1 %v2820_v43  ;;  %2599 = vmatprep.subr.bf16.mxu0 %v2821_v44  ;;  %v38_v43 = vld [vmem:[%s3551_s0 + $0xb8] sm:$0xff]  ;;  %v2221_v44 = vcombine.low %v25_v40, %v37_v41 }
  0x8e   :  { %2621 = vmatprep.subr.bf16.mxu1 %v2822_v45  ;;  %v2222_v45 = vcombine.high %v25_v40, %v37_v41 }
  0x90   :  { %2600 = vmatpush3.bf16.msra.mxu0 %v2823_v46  ;;  %v2223_v46 = vcombine.low %v26_v42, %v38_v43 }
  0x91   :  { %2622 = vmatpush3.bf16.msra.mxu1 %v2824_v47  ;;  %2601 = vmatprep.subr.bf16.mxu0 %v2825_v48  ;;  %v2224_v47 = vcombine.high %v26_v42, %v38_v43 }
  0x92   :  { %2623 = vmatprep.subr.bf16.mxu1 %v2826_v49 }
  0x94   :  { %2602 = vmatpush3.bf16.msra.mxu0 %v2827_v50  ;;  %v2200_v50 = vld [vmem:[%s3552_s2] ss:$0 sm:$0xff] }
  0x95   :  { %2624 = vmatpush3.bf16.msra.mxu1 %v2828_v51  ;;  %2603 = vmatprep.subr.bf16.mxu0 %v2829_v52 }
  0x96   :  { %2625 = vmatprep.subr.bf16.mxu1 %v2830_v53 }
  0x98   :  { %2604 = vmatpush3.bf16.msra.mxu0 %v2831_v54 }
  0x99   :  { %2626 = vmatpush3.bf16.msra.mxu1 %v2832_v55  ;;  %2605 = vmatprep.subr.bf16.mxu0 %v2833_v56 }
  0x9a   :  { %2627 = vmatprep.subr.bf16.mxu1 %v2834_v57 }
  0x9c   :  { %2606 = vmatpush3.bf16.msra.mxu0 %v2835_v58 }
  0x9d   :  { %2628 = vmatpush3.bf16.msra.mxu1 %v2836_v59  ;;  %2607 = vmatprep.subr.bf16.mxu0 %v2837_v60 }
  0x9e   :  { %2629 = vmatprep.subr.bf16.mxu1 %v2838_v61 }
  0xa0   :  { %2608 = vmatpush3.bf16.msra.mxu0 %v2839_v62 }
  0xa1   :  { %2630 = vmatpush3.bf16.msra.mxu1 %v2840_v63  ;;  %2637 = vmatprep.subr.bf16.mxu0 %v2841_v8 }
  0xa2   :  { %2659 = vmatprep.subr.bf16.mxu1 %v2842_v9 }
  0xa3   :  { %2063 = vmatmul.mubr.bf16.vlgmr.msra.gmra.mrb[16].mxu0 %v2217_v2 }
  0xa4   :  { %2104 = vmatmul.mubr.bf16.vlgmr.msra.gmra.mrb[16].mxu1 %v2219_v6  ;;  %2638 = vmatpush3.bf16.msra.mxu0 %v2843_v10 }
  0xa5   :  { %2660 = vmatpush3.bf16.msra.mxu1 %v2844_v11  ;;  %2639 = vmatprep.subr.bf16.mxu0 %v2845_v12 }
  0xa6   :  { %2661 = vmatprep.subr.bf16.mxu1 %v2846_v13  ;;  %2144 = vmatprep.mubr.bf16.mxu0 %v2222_v45 }
  0xa7   :  { %2185 = vmatprep.mubr.bf16.mxu1 %v2224_v47 }
  0xa8   :  { %2640 = vmatpush3.bf16.msra.mxu0 %v2847_v14 }
  0xa9   :  { %2662 = vmatpush3.bf16.msra.mxu1 %v2848_v15  ;;  %2641 = vmatprep.subr.bf16.mxu0 %v2849_v16 }
  0xaa   :  { %2663 = vmatprep.subr.bf16.mxu1 %v2850_v17 }
  0xac   :  { %2642 = vmatpush3.bf16.msra.mxu0 %v2851_v18 }
  0xad   :  { %2664 = vmatpush3.bf16.msra.mxu1 %v2852_v19  ;;  %2643 = vmatprep.subr.bf16.mxu0 %v2853_v20 }
  0xae   :  { %2665 = vmatprep.subr.bf16.mxu1 %v2854_v21 }
  0xb0   :  { %2644 = vmatpush3.bf16.msra.mxu0 %v2855_v22 }
  0xb1   :  { %2666 = vmatpush3.bf16.msra.mxu1 %v2856_v23  ;;  %2645 = vmatprep.subr.bf16.mxu0 %v2857_v24 }
  0xb2   :  { %2667 = vmatprep.subr.bf16.mxu1 %v2858_v25 }
  0xb4   :  { %2646 = vmatpush3.bf16.msra.mxu0 %v2859_v26 }
  0xb5   :  { %2668 = vmatpush3.bf16.msra.mxu1 %v2860_v27  ;;  %2647 = vmatprep.subr.bf16.mxu0 %v2861_v28 }
  0xb6   :  { %2669 = vmatprep.subr.bf16.mxu1 %v2862_v29 }
  0xb8   :  { %2648 = vmatpush3.bf16.msra.mxu0 %v2863_v30 }
  0xb9   :  { %2670 = vmatpush3.bf16.msra.mxu1 %v2864_v31  ;;  %2649 = vmatprep.subr.bf16.mxu0 %v2865_v32 }
  0xba   :  { %2671 = vmatprep.subr.bf16.mxu1 %v2866_v33 }
  0xbc   :  { %2650 = vmatpush3.bf16.msra.mxu0 %v2867_v34 }
  0xbd   :  { %2672 = vmatpush3.bf16.msra.mxu1 %v2868_v35  ;;  %2651 = vmatprep.subr.bf16.mxu0 %v2869_v36 }
  0xbe   :  { %2673 = vmatprep.subr.bf16.mxu1 %v2870_v37 }
  0xc0   :  { %2652 = vmatpush3.bf16.msra.mxu0 %v2871_v38 }
  0xc1   :  { %2674 = vmatpush3.bf16.msra.mxu1 %v2872_v39 }
  0xc3   :  { %2145 = vmatmul.mubr.bf16.vlgmr.msra.gmra.mrb[20].mxu0 %v2221_v44 }
  0xc4   :  { %2186 = vmatmul.mubr.bf16.vlgmr.msra.gmra.mrb[20].mxu1 %v2223_v46 }
  0xf6   :  { %v2433_v48 = vpop.f32.mrb[0].mxu0 }
  0xf7   :  { %v2455_v49 = vpop.f32.mrb[0].mxu1  ;;  %v2434_v51 = vpop.f32.mrb[1].mxu0 }
  0xf8   :  { %v2435_v52 = vadd.f32 %v2434_v51, %v2433_v48  ;;  %v2456_v53 = vpop.f32.mrb[1].mxu1  ;;  %v2436_v54 = vpop.f32.mrb[2].mxu0 }
  0xf9   :  { %v2457_v55 = vadd.f32 %v2456_v53, %v2455_v49  ;;  %v2458_v56 = vpop.f32.mrb[2].mxu1  ;;  %v2437_v57 = vpop.f32.mrb[3].mxu0 }
  0xfa   :  { %v1737_v58 = vadd.f32 %v2435_v52, %v2200_v50  ;;  %v2438_v59 = vadd.f32 %v2437_v57, %v2436_v54  ;;  %v2459_v60 = vpop.f32.mrb[3].mxu1 }
  0xfb   :  { %v2460_v61 = vadd.f32 %v2459_v60, %v2458_v56 }
  0xfc   :  { %v1778_v62 = vadd.f32 %v2457_v55, %v1737_v58  ;;  %v1740_v63 = vadd.f32 %v2438_v59, %v2200_v50 }
  0xfe   :  { %v1781_v0 = vadd.f32 %v2460_v61, %v1740_v63 }
 0x116   :  { %v2477_v1 = vpop.f32.mrb[4].mxu0 }
 0x117   :  { %v2499_v2 = vpop.f32.mrb[4].mxu1  ;;  %v2478_v3 = vpop.f32.mrb[5].mxu0 }
 0x118   :  { %v2479_v4 = vadd.f32 %v2478_v3, %v2477_v1  ;;  %v2500_v5 = vpop.f32.mrb[5].mxu1  ;;  %v2480_v6 = vpop.f32.mrb[6].mxu0 }
 0x119   :  { %v2501_v7 = vadd.f32 %v2500_v5, %v2499_v2  ;;  %v2502_v8 = vpop.f32.mrb[6].mxu1  ;;  %v2481_v9 = vpop.f32.mrb[7].mxu0 }
 0x11a   :  { %v1819_v10 = vadd.f32 %v2479_v4, %v1778_v62  ;;  %v2482_v11 = vadd.f32 %v2481_v9, %v2480_v6  ;;  %v2503_v12 = vpop.f32.mrb[7].mxu1 }
 0x11b   :  { %v2504_v13 = vadd.f32 %v2503_v12, %v2502_v8 }
 0x11c   :  { %v1860_v14 = vadd.f32 %v2501_v7, %v1819_v10  ;;  %v1822_v15 = vadd.f32 %v2482_v11, %v1781_v0 }
 0x11e   :  { %v1863_v16 = vadd.f32 %v2504_v13, %v1822_v15 }
 0x136   :  { %v2521_v17 = vpop.f32.mrb[8].mxu0 }
 0x137   :  { %v2543_v18 = vpop.f32.mrb[8].mxu1  ;;  %v2522_v19 = vpop.f32.mrb[9].mxu0 }
 0x138   :  { %v2544_v20 = vpop.f32.mrb[9].mxu1  ;;  %v2523_v21 = vadd.f32 %v2522_v19, %v2521_v17  ;;  %v2524_v23 = vpop.f32.mrb[10].mxu0 }
 0x139   :  { %v2545_v22 = vadd.f32 %v2544_v20, %v2543_v18  ;;  %v2546_v24 = vpop.f32.mrb[10].mxu1  ;;  %v2525_v25 = vpop.f32.mrb[11].mxu0 }
 0x13a   :  { %v2547_v26 = vpop.f32.mrb[11].mxu1  ;;  %v1901_v27 = vadd.f32 %v2523_v21, %v1860_v14  ;;  %v2526_v28 = vadd.f32 %v2525_v25, %v2524_v23 }
 0x13b   :  { %v2548_v29 = vadd.f32 %v2547_v26, %v2546_v24 }
 0x13c   :  { %v1942_v30 = vadd.f32 %v2545_v22, %v1901_v27  ;;  %v1904_v31 = vadd.f32 %v2526_v28, %v1863_v16 }
 0x13e   :  { %v1945_v32 = vadd.f32 %v2548_v29, %v1904_v31 }
 0x156   :  { %v2565_v33 = vpop.f32.mrb[12].mxu0 }
 0x157   :  { %v2587_v34 = vpop.f32.mrb[12].mxu1  ;;  %v2566_v35 = vpop.f32.mrb[13].mxu0 }
 0x158   :  { %v2567_v36 = vadd.f32 %v2566_v35, %v2565_v33  ;;  %v2588_v37 = vpop.f32.mrb[13].mxu1  ;;  %v2568_v38 = vpop.f32.mrb[14].mxu0 }
 0x159   :  { %v2589_v39 = vadd.f32 %v2588_v37, %v2587_v34  ;;  %v2590_v40 = vpop.f32.mrb[14].mxu1  ;;  %v2569_v41 = vpop.f32.mrb[15].mxu0 }
 0x15a   :  { %v1983_v42 = vadd.f32 %v2567_v36, %v1942_v30  ;;  %v2570_v43 = vadd.f32 %v2569_v41, %v2568_v38  ;;  %v2591_v44 = vpop.f32.mrb[15].mxu1 }
 0x15b   :  { %v2592_v45 = vadd.f32 %v2591_v44, %v2590_v40 }
 0x15c   :  { %v2024_v46 = vadd.f32 %v2589_v39, %v1983_v42  ;;  %v1986_v47 = vadd.f32 %v2570_v43, %v1945_v32 }
 0x15e   :  { %v2027_v48 = vadd.f32 %v2592_v45, %v1986_v47 }
 0x176   :  { %v2609_v49 = vpop.f32.mrb[16].mxu0 }
 0x177   :  { %v2631_v50 = vpop.f32.mrb[16].mxu1  ;;  %v2610_v51 = vpop.f32.mrb[17].mxu0 }
 0x178   :  { %v2611_v52 = vadd.f32 %v2610_v51, %v2609_v49  ;;  %v2632_v53 = vpop.f32.mrb[17].mxu1  ;;  %v2612_v54 = vpop.f32.mrb[18].mxu0 }
 0x179   :  { %v2633_v55 = vadd.f32 %v2632_v53, %v2631_v50  ;;  %v2634_v56 = vpop.f32.mrb[18].mxu1  ;;  %v2613_v57 = vpop.f32.mrb[19].mxu0 }
 0x17a   :  { %v2065_v58 = vadd.f32 %v2611_v52, %v2024_v46  ;;  %v2614_v59 = vadd.f32 %v2613_v57, %v2612_v54  ;;  %v2635_v60 = vpop.f32.mrb[19].mxu1 }
 0x17b   :  { %v2636_v61 = vadd.f32 %v2635_v60, %v2634_v56 }
 0x17c   :  { %v2106_v62 = vadd.f32 %v2633_v55, %v2065_v58  ;;  %v2068_v63 = vadd.f32 %v2614_v59, %v2027_v48 }
 0x17e   :  { %v2109_v0 = vadd.f32 %v2636_v61, %v2068_v63 }
 0x196   :  { %v2653_v1 = vpop.f32.mrb[20].mxu0 }
 0x197   :  { %v2675_v2 = vpop.f32.mrb[20].mxu1  ;;  %v2654_v3 = vpop.f32.mrb[21].mxu0 }
 0x198   :  { %v2676_v4 = vpop.f32.mrb[21].mxu1  ;;  %v2655_v5 = vadd.f32 %v2654_v3, %v2653_v1  ;;  %v2656_v7 = vpop.f32.mrb[22].mxu0 }
 0x199   :  { %v2677_v6 = vadd.f32 %v2676_v4, %v2675_v2  ;;  %v2678_v8 = vpop.f32.mrb[22].mxu1  ;;  %v2657_v9 = vpop.f32.mrb[23].mxu0 }
 0x19a   :  { %v2679_v10 = vpop.f32.mrb[23].mxu1  ;;  %v2147_v11 = vadd.f32 %v2655_v5, %v2106_v62  ;;  %v2658_v12 = vadd.f32 %v2657_v9, %v2656_v7 }
 0x19b   :  { %v2680_v13 = vadd.f32 %v2679_v10, %v2678_v8 }
 0x19c   :  { %v2188_v14 = vadd.f32 %v2677_v6, %v2147_v11  ;;  %v2150_v15 = vadd.f32 %v2658_v12, %v2109_v0 }
 0x19e   :  { %2194 = vst [vmem:[%s3553_s3] sm:$0xff] %v2188_v14  ;;  %v2191_v16 = vadd.f32 %v2680_v13, %v2150_v15 }
 0x1a0   :  { %2195 = vst [vmem:[%s3553_s3 + $0x8] sm:$0xff] %v2191_v16 }

</bundles_post_ra>
